<compile_context>
chip_gen: v7x
topology: tpu7x:2x2x1
jax: 0.10.0
libtpu: 0.0.40
codegen_flags: <defaults>
</compile_context>

<pallas_src>
import numpy as np
import jax
import jax.numpy as jnp
from jax import lax
from jax.experimental import pallas as pl
from jax.experimental.pallas import tpu as pltpu

EPS_BN = 1e-5
NEG_SLOPE = 0.2
MASK_VAL = -1e30


def _vmem_specs(n):
    return [pl.BlockSpec(memory_space=pltpu.MemorySpace.VMEM) for _ in range(n)]


# --------------------------- fused forward kernel ----------------------------
def _gat_layer(x, w, c, a_src_w, a_dst_w, bias, mask):
    # BN-folded linear: h = x @ W' + c   (c == 0 when no BN precedes this conv)
    h = jnp.dot(x, w, preferred_element_type=jnp.float32) + c           # [N, D]
    # attention logits via rank-1 products; source term comes out as [1, N]
    # directly, avoiding any narrow transpose.
    a_dst = lax.dot_general(h, a_dst_w, (((1,), (1,)), ((), ())),
                            preferred_element_type=jnp.float32)          # [N, 1]
    a_src = lax.dot_general(a_src_w, h, (((1,), (1,)), ((), ())),
                            preferred_element_type=jnp.float32)          # [1, N]
    e = a_dst + a_src                       # e[i, j] = a_dst_i + a_src_j
    e = jnp.maximum(e, NEG_SLOPE * e)       # LeakyReLU(0.2), no compare/select
    e = e + mask                            # additive mask: -1e30 on non-edges
    m = jnp.max(e, axis=-1, keepdims=True)  # finite: self-loops guarantee a hit
    p = jnp.exp(e - m)                      # masked entries underflow to 0
    denom = jnp.sum(p, axis=-1, keepdims=True)
    alpha = p * pl.reciprocal(denom, approx=True)   # EUP slot (~free)
    out = jnp.dot(alpha, h, preferred_element_type=jnp.float32) + bias
    return jnp.maximum(out, 0.0)            # ReLU


def _fused_forward_kernel(x_ref, mask_ref, pool_ref,
                          w1_ref, c1_ref, as1_ref, ad1_ref, b1_ref,
                          ws_ref, cs_ref, ass_ref, ads_ref, bs_ref,
                          s3_ref, t3_ref,
                          fw1_ref, fb1_ref, fw2_ref, fb2_ref, fw3_ref, fb3_ref,
                          o_ref):
    mask = mask_ref[...]
    # conv1 (+ ReLU), with BN1 folded into w1/c1
    x = _gat_layer(x_ref[...], w1_ref[...], c1_ref[...],
                   as1_ref[...], ad1_ref[...], b1_ref[...], mask)
    # repeated convs (+ ReLU); BN2 folded into layer 0.  Static unroll (3 iters).
    for l in range(ws_ref.shape[0]):
        x = _gat_layer(x, ws_ref[l], cs_ref[l], ass_ref[l], ads_ref[l],
                       bs_ref[l], mask)
    # BN3 as a fused scale/shift (2 cheap VPU ops)
    x = x * s3_ref[...] + t3_ref[...]
    # global_add_pool via one-hot pooling matmul, then MLP head
    z = jnp.dot(pool_ref[...], x, preferred_element_type=jnp.float32)   # [G, D]
    z = jnp.maximum(jnp.dot(z, fw1_ref[...],
                            preferred_element_type=jnp.float32) + fb1_ref[...],
                    0.0)
    # dropout is identity in eval mode
    z = jnp.maximum(jnp.dot(z, fw2_ref[...],
                            preferred_element_type=jnp.float32) + fb2_ref[...],
                    0.0)
    o_ref[...] = jnp.dot(z, fw3_ref[...],
                         preferred_element_type=jnp.float32) + fb3_ref[...]


# ------------------------ host-side parameter folding ------------------------
def _fold_params(adj, p):
    def bn_scale_shift(bn):
        gamma, beta, mean, var = bn
        s = gamma * jax.lax.rsqrt(var + EPS_BN)
        return s, beta - mean * s

    s1, t1 = bn_scale_shift(p["bn1"])
    s2, t2 = bn_scale_shift(p["bn2"])
    s3, t3 = bn_scale_shift(p["bn3"])

    # BN1 folded into conv1's linear transform:  BN(x) @ W = x @ W' + c
    w1, as1, ad1, b1 = p["conv1"]
    w1f = w1 * s1.reshape(-1, 1)
    c1 = t1 @ w1

    # repeated convs; BN2 folded into the first one
    ws, cs, ass, ads, bs = [], [], [], [], []
    for i, (w, asrc, adst, b) in enumerate(p["convs"]):
        if i == 0:
            ws.append(w * s2.reshape(-1, 1))
            cs.append(t2 @ w)
        else:
            ws.append(w)
            cs.append(jnp.zeros_like(b))
        ass.append(asrc)
        ads.append(adst)
        bs.append(b)
    ws = jnp.stack(ws)    # [L-1, D, D]
    cs = jnp.stack(cs)    # [L-1, 1, D]
    ass = jnp.stack(ass)  # [L-1, 1, D]
    ads = jnp.stack(ads)  # [L-1, 1, D]
    bs = jnp.stack(bs)    # [L-1, 1, D]

    # additive edge mask (replaces two selects per conv layer)
    mask = jnp.where(adj > 0, 0.0, MASK_VAL).astype(jnp.float32)

    fw1, fb1 = p["fc1"]
    fw2, fb2 = p["fc2"]
    fw3, fb3 = p["fc3"]
    return (mask, w1f, c1, as1, ad1, b1,
            ws, cs, ass, ads, bs, s3, t3,
            fw1, fb1, fw2, fb2, fw3, fb3)


# ------------------------------ full forward ---------------------------------
def gat_forward(x, adj, pool, p):
    (mask, w1f, c1, as1, ad1, b1,
     ws, cs, ass, ads, bs, s3, t3,
     fw1, fb1, fw2, fb2, fw3, fb3) = _fold_params(adj, p)
    g = pool.shape[0]
    nb_class = fw3.shape[1]
    return pl.pallas_call(
        _fused_forward_kernel,
        out_shape=jax.ShapeDtypeStruct((g, nb_class), jnp.float32),
        in_specs=_vmem_specs(21),
        out_specs=pl.BlockSpec(memory_space=pltpu.MemorySpace.VMEM),
    )(x, mask, pool,
      w1f, c1, as1, ad1, b1,
      ws, cs, ass, ads, bs,
      s3, t3,
      fw1, fb1, fw2, fb2, fw3, fb3)


# ---------------------------- pure-JAX reference -----------------------------
def _ref_forward(x, adj, pool, p):
    def bn(x, g, b, m, v):
        return (x - m) * jax.lax.rsqrt(v + EPS_BN) * g + b

    def gat(x, w, asrc, adst, bias):
        h = x @ w
        a_dst = h @ adst.T                    # [N, 1]
        a_src = (h @ asrc.T).T                # [1, N]
        e = a_dst + a_src
        e = jnp.where(e > 0, e, NEG_SLOPE * e)
        e = jnp.where(adj > 0, e, MASK_VAL)
        m = e.max(-1, keepdims=True)
        pr = jnp.where(adj > 0, jnp.exp(e - m), 0.0)
        alpha = pr / pr.sum(-1, keepdims=True)
        return jnp.maximum(alpha @ h + bias, 0.0)

    x = bn(x, *p["bn1"])
    x = gat(x, *p["conv1"])
    x = bn(x, *p["bn2"])
    for layer in p["convs"]:
        x = gat(x, *layer)
    x = bn(x, *p["bn3"])
    x = pool @ x
    w1, b1 = p["fc1"]
    w2, b2 = p["fc2"]
    w3, b3 = p["fc3"]
    x = jnp.maximum(x @ w1 + b1, 0.0)
    x = jnp.maximum(x @ w2 + b2, 0.0)
    return x @ w3 + b3


# ---------------------------- parameter creation -----------------------------
def make_params(key, in_size, d_model, nb_class, nb_layers):
    def nrm(k, shape, scale=0.1):
        return (scale * jax.random.normal(k, shape)).astype(jnp.float32)

    def bn_params(k, f):
        k1, k2, k3, k4 = jax.random.split(k, 4)
        gamma = 1.0 + nrm(k1, (1, f))
        beta = nrm(k2, (1, f))
        mean = nrm(k3, (1, f))
        var = jax.random.uniform(k4, (1, f), minval=0.5, maxval=1.5).astype(jnp.float32)
        return (gamma, beta, mean, var)

    def gat_params(k, fin, fout):
        k1, k2, k3, k4 = jax.random.split(k, 4)
        return (nrm(k1, (fin, fout), 0.2), nrm(k2, (1, fout), 0.3),
                nrm(k3, (1, fout), 0.3), nrm(k4, (1, fout), 0.1))

    def fc_params(k, fin, fout):
        k1, k2 = jax.random.split(k)
        return (nrm(k1, (fin, fout), 0.2), nrm(k2, (1, fout), 0.1))

    keys = jax.random.split(key, 9)
    params = {
        "bn1": bn_params(keys[0], in_size),
        "bn2": bn_params(keys[1], d_model),
        "bn3": bn_params(keys[2], d_model),
        "conv1": gat_params(keys[3], in_size, d_model),
        "convs": [gat_params(k, d_model, d_model)
                  for k in jax.random.split(keys[4], nb_layers - 1)],
        "fc1": fc_params(keys[5], d_model, d_model),
        "fc2": fc_params(keys[6], d_model, d_model // 2),
        "fc3": fc_params(keys[7], d_model // 2, nb_class),
    }
    # TODO(synk): self.classifier Sequential is defined in __init__ but unused
    # in forward(), so it is not materialized here.
    return params


if __name__ == "__main__":
    IN_SIZE, D_MODEL, NB_CLASS, NB_LAYERS = 8, 32, 4, 4
    N_NODES, N_GRAPHS = 16, 2

    key = jax.random.PRNGKey(0)
    k_x, k_p = jax.random.split(key)

    # node features [N, in_size]
    x = jax.random.normal(k_x, (N_NODES, IN_SIZE), dtype=jnp.float32)

    # deterministic edge_index -> dense adjacency adj[dst, src], + self-loops
    edges = []
    per_graph = N_NODES // N_GRAPHS
    for g in range(N_GRAPHS):
        base = g * per_graph
        for i in range(per_graph):
            edges.append((base + i, base + (i + 1) % per_graph))
            edges.append((base + (i + 1) % per_graph, base + i))
            edges.append((base + i, base + (i + 3) % per_graph))
    adj_np = np.zeros((N_NODES, N_NODES), np.float32)
    for src, dst in edges:
        adj_np[dst, src] = 1.0
    np.fill_diagonal(adj_np, 1.0)          # PyG GATConv add_self_loops=True
    adj = jnp.asarray(adj_np)

    # batch assignment -> one-hot pooling matrix [G, N] (global_add_pool)
    batch = np.repeat(np.arange(N_GRAPHS), per_graph)
    pool_np = np.zeros((N_GRAPHS, N_NODES), np.float32)
    pool_np[batch, np.arange(N_NODES)] = 1.0
    pool = jnp.asarray(pool_np)

    params = make_params(k_p, IN_SIZE, D_MODEL, NB_CLASS, NB_LAYERS)

    fwd = jax.jit(gat_forward)
    out = jax.block_until_ready(fwd(x, adj, pool, params))

    ref = jax.block_until_ready(_ref_forward(x, adj, pool, params))
    assert out.shape == (N_GRAPHS, NB_CLASS)
    # tolerance accounts for pl.reciprocal(approx=True) in the 4 softmax layers
    np.testing.assert_allclose(np.asarray(out), np.asarray(ref),
                               rtol=2e-2, atol=2e-2)
    print("KERNEL_OK")
</pallas_src>

<mosaic_0001>
module attributes {stable_mosaic.version = 11 : i64} {
  func.func @_fused_forward_kernel(%arg0: memref<16x8xf32, #tpu.memory_space<vmem>>, %arg1: memref<16x16xf32, #tpu.memory_space<vmem>>, %arg2: memref<2x16xf32, #tpu.memory_space<vmem>>, %arg3: memref<8x32xf32, #tpu.memory_space<vmem>>, %arg4: memref<1x32xf32, #tpu.memory_space<vmem>>, %arg5: memref<1x32xf32, #tpu.memory_space<vmem>>, %arg6: memref<1x32xf32, #tpu.memory_space<vmem>>, %arg7: memref<1x32xf32, #tpu.memory_space<vmem>>, %arg8: memref<3x32x32xf32, #tpu.memory_space<vmem>>, %arg9: memref<3x1x32xf32, #tpu.memory_space<vmem>>, %arg10: memref<3x1x32xf32, #tpu.memory_space<vmem>>, %arg11: memref<3x1x32xf32, #tpu.memory_space<vmem>>, %arg12: memref<3x1x32xf32, #tpu.memory_space<vmem>>, %arg13: memref<1x32xf32, #tpu.memory_space<vmem>>, %arg14: memref<1x32xf32, #tpu.memory_space<vmem>>, %arg15: memref<32x32xf32, #tpu.memory_space<vmem>>, %arg16: memref<1x32xf32, #tpu.memory_space<vmem>>, %arg17: memref<32x16xf32, #tpu.memory_space<vmem>>, %arg18: memref<1x16xf32, #tpu.memory_space<vmem>>, %arg19: memref<16x4xf32, #tpu.memory_space<vmem>>, %arg20: memref<1x4xf32, #tpu.memory_space<vmem>>, %arg21: memref<2x4xf32, #tpu.memory_space<vmem>>) attributes {dimension_semantics = [], scalar_prefetch = 0 : i64, scratch_operands = 0 : i64, tpu.core_type = #tpu.core_type<tc>} {
    %c0 = arith.constant 0 : index
    %c0_0 = arith.constant 0 : index
    %0 = vector.load %arg1[%c0, %c0_0] : memref<16x16xf32, #tpu.memory_space<vmem>>, vector<16x16xf32>
    %c0_1 = arith.constant 0 : index
    %c0_2 = arith.constant 0 : index
    %1 = vector.load %arg0[%c0_1, %c0_2] : memref<16x8xf32, #tpu.memory_space<vmem>>, vector<16x8xf32>
    %c0_3 = arith.constant 0 : index
    %c0_4 = arith.constant 0 : index
    %2 = vector.load %arg3[%c0_3, %c0_4] : memref<8x32xf32, #tpu.memory_space<vmem>>, vector<8x32xf32>
    %c0_5 = arith.constant 0 : index
    %c0_6 = arith.constant 0 : index
    %3 = vector.load %arg4[%c0_5, %c0_6] : memref<1x32xf32, #tpu.memory_space<vmem>>, vector<1x32xf32>
    %c0_7 = arith.constant 0 : index
    %c0_8 = arith.constant 0 : index
    %4 = vector.load %arg5[%c0_7, %c0_8] : memref<1x32xf32, #tpu.memory_space<vmem>>, vector<1x32xf32>
    %c0_9 = arith.constant 0 : index
    %c0_10 = arith.constant 0 : index
    %5 = vector.load %arg6[%c0_9, %c0_10] : memref<1x32xf32, #tpu.memory_space<vmem>>, vector<1x32xf32>
    %c0_11 = arith.constant 0 : index
    %c0_12 = arith.constant 0 : index
    %6 = vector.load %arg7[%c0_11, %c0_12] : memref<1x32xf32, #tpu.memory_space<vmem>>, vector<1x32xf32>
    %cst = arith.constant dense<0.000000e+00> : vector<16x32xf32>
    %7 = tpu.matmul %1, %2, %cst {dimension_numbers = #tpu.dot_dimension_numbers<[1], [0], [0], [1], [0, 0, 1, 1], [], []>} : vector<16x8xf32>, vector<8x32xf32>, vector<16x32xf32> -> vector<16x32xf32>
    %8 = vector.broadcast %3 : vector<1x32xf32> to vector<16x32xf32>
    %9 = arith.addf %7, %8 : vector<16x32xf32>
    %cst_13 = arith.constant dense<0.000000e+00> : vector<16x1xf32>
    %10 = tpu.matmul %9, %5, %cst_13 {dimension_numbers = #tpu.dot_dimension_numbers<[1], [1], [0], [0], [0, 0, 1, 0], [], []>} : vector<16x32xf32>, vector<1x32xf32>, vector<16x1xf32> -> vector<16x1xf32>
    %cst_14 = arith.constant dense<0.000000e+00> : vector<1x16xf32>
    %11 = tpu.matmul %4, %9, %cst_14 {dimension_numbers = #tpu.dot_dimension_numbers<[1], [1], [0], [0], [0, 0, 1, 0], [], []>} : vector<1x32xf32>, vector<16x32xf32>, vector<1x16xf32> -> vector<1x16xf32>
    %12 = vector.broadcast %10 : vector<16x1xf32> to vector<16x16xf32>
    %13 = vector.broadcast %11 : vector<1x16xf32> to vector<16x16xf32>
    %14 = arith.addf %12, %13 : vector<16x16xf32>
    %cst_15 = arith.constant 2.000000e-01 : f32
    %15 = vector.broadcast %cst_15 : f32 to vector<16x16xf32>
    %16 = arith.mulf %15, %14 : vector<16x16xf32>
    %17 = arith.maximumf %14, %16 : vector<16x16xf32>
    %18 = arith.addf %17, %0 : vector<16x16xf32>
    %cst_16 = arith.constant dense<0xFF800000> : vector<16xf32>
    %19 = vector.multi_reduction <maximumf>, %18, %cst_16 [1] : vector<16x16xf32> to vector<16xf32>
    %20 = vector.shape_cast %19 : vector<16xf32> to vector<16x1xf32>
    %21 = vector.broadcast %20 : vector<16x1xf32> to vector<16x16xf32>
    %22 = arith.subf %18, %21 : vector<16x16xf32>
    %23 = math.exp %22 : vector<16x16xf32>
    %cst_17 = arith.constant dense<0.000000e+00> : vector<16xf32>
    %24 = vector.multi_reduction <add>, %23, %cst_17 [1] : vector<16x16xf32> to vector<16xf32>
    %25 = vector.shape_cast %24 : vector<16xf32> to vector<16x1xf32>
    %26 = tpu.reciprocal %25 {approx = true} : vector<16x1xf32> -> vector<16x1xf32>
    %27 = vector.broadcast %26 : vector<16x1xf32> to vector<16x16xf32>
    %28 = arith.mulf %23, %27 : vector<16x16xf32>
    %cst_18 = arith.constant dense<0.000000e+00> : vector<16x32xf32>
    %29 = tpu.matmul %28, %9, %cst_18 {dimension_numbers = #tpu.dot_dimension_numbers<[1], [0], [0], [1], [0, 0, 1, 1], [], []>} : vector<16x16xf32>, vector<16x32xf32>, vector<16x32xf32> -> vector<16x32xf32>
    %30 = vector.broadcast %6 : vector<1x32xf32> to vector<16x32xf32>
    %31 = arith.addf %29, %30 : vector<16x32xf32>
    %cst_19 = arith.constant 0.000000e+00 : f32
    %32 = vector.broadcast %cst_19 : f32 to vector<16x32xf32>
    %33 = arith.maximumf %31, %32 : vector<16x32xf32>
    %c0_20 = arith.constant 0 : index
    %c0_21 = arith.constant 0 : index
    %c0_22 = arith.constant 0 : index
    %34 = vector.load %arg8[%c0_20, %c0_21, %c0_22] : memref<3x32x32xf32, #tpu.memory_space<vmem>>, vector<1x32x32xf32>
    %35 = vector.shape_cast %34 : vector<1x32x32xf32> to vector<32x32xf32>
    %c0_23 = arith.constant 0 : index
    %c0_24 = arith.constant 0 : index
    %c0_25 = arith.constant 0 : index
    %36 = vector.load %arg9[%c0_23, %c0_24, %c0_25] : memref<3x1x32xf32, #tpu.memory_space<vmem>>, vector<1x1x32xf32>
    %37 = vector.shape_cast %36 : vector<1x1x32xf32> to vector<1x32xf32>
    %c0_26 = arith.constant 0 : index
    %c0_27 = arith.constant 0 : index
    %c0_28 = arith.constant 0 : index
    %38 = vector.load %arg10[%c0_26, %c0_27, %c0_28] : memref<3x1x32xf32, #tpu.memory_space<vmem>>, vector<1x1x32xf32>
    %39 = vector.shape_cast %38 : vector<1x1x32xf32> to vector<1x32xf32>
    %c0_29 = arith.constant 0 : index
    %c0_30 = arith.constant 0 : index
    %c0_31 = arith.constant 0 : index
    %40 = vector.load %arg11[%c0_29, %c0_30, %c0_31] : memref<3x1x32xf32, #tpu.memory_space<vmem>>, vector<1x1x32xf32>
    %41 = vector.shape_cast %40 : vector<1x1x32xf32> to vector<1x32xf32>
    %c0_32 = arith.constant 0 : index
    %c0_33 = arith.constant 0 : index
    %c0_34 = arith.constant 0 : index
    %42 = vector.load %arg12[%c0_32, %c0_33, %c0_34] : memref<3x1x32xf32, #tpu.memory_space<vmem>>, vector<1x1x32xf32>
    %43 = vector.shape_cast %42 : vector<1x1x32xf32> to vector<1x32xf32>
    %cst_35 = arith.constant dense<0.000000e+00> : vector<16x32xf32>
    %44 = tpu.matmul %33, %35, %cst_35 {dimension_numbers = #tpu.dot_dimension_numbers<[1], [0], [0], [1], [0, 0, 1, 1], [], []>} : vector<16x32xf32>, vector<32x32xf32>, vector<16x32xf32> -> vector<16x32xf32>
    %45 = vector.broadcast %37 : vector<1x32xf32> to vector<16x32xf32>
    %46 = arith.addf %44, %45 : vector<16x32xf32>
    %cst_36 = arith.constant dense<0.000000e+00> : vector<16x1xf32>
    %47 = tpu.matmul %46, %41, %cst_36 {dimension_numbers = #tpu.dot_dimension_numbers<[1], [1], [0], [0], [0, 0, 1, 0], [], []>} : vector<16x32xf32>, vector<1x32xf32>, vector<16x1xf32> -> vector<16x1xf32>
    %cst_37 = arith.constant dense<0.000000e+00> : vector<1x16xf32>
    %48 = tpu.matmul %39, %46, %cst_37 {dimension_numbers = #tpu.dot_dimension_numbers<[1], [1], [0], [0], [0, 0, 1, 0], [], []>} : vector<1x32xf32>, vector<16x32xf32>, vector<1x16xf32> -> vector<1x16xf32>
    %49 = vector.broadcast %47 : vector<16x1xf32> to vector<16x16xf32>
    %50 = vector.broadcast %48 : vector<1x16xf32> to vector<16x16xf32>
    %51 = arith.addf %49, %50 : vector<16x16xf32>
    %cst_38 = arith.constant 2.000000e-01 : f32
    %52 = vector.broadcast %cst_38 : f32 to vector<16x16xf32>
    %53 = arith.mulf %52, %51 : vector<16x16xf32>
    %54 = arith.maximumf %51, %53 : vector<16x16xf32>
    %55 = arith.addf %54, %0 : vector<16x16xf32>
    %cst_39 = arith.constant dense<0xFF800000> : vector<16xf32>
    %56 = vector.multi_reduction <maximumf>, %55, %cst_39 [1] : vector<16x16xf32> to vector<16xf32>
    %57 = vector.shape_cast %56 : vector<16xf32> to vector<16x1xf32>
    %58 = vector.broadcast %57 : vector<16x1xf32> to vector<16x16xf32>
    %59 = arith.subf %55, %58 : vector<16x16xf32>
    %60 = math.exp %59 : vector<16x16xf32>
    %cst_40 = arith.constant dense<0.000000e+00> : vector<16xf32>
    %61 = vector.multi_reduction <add>, %60, %cst_40 [1] : vector<16x16xf32> to vector<16xf32>
    %62 = vector.shape_cast %61 : vector<16xf32> to vector<16x1xf32>
    %63 = tpu.reciprocal %62 {approx = true} : vector<16x1xf32> -> vector<16x1xf32>
    %64 = vector.broadcast %63 : vector<16x1xf32> to vector<16x16xf32>
    %65 = arith.mulf %60, %64 : vector<16x16xf32>
    %cst_41 = arith.constant dense<0.000000e+00> : vector<16x32xf32>
    %66 = tpu.matmul %65, %46, %cst_41 {dimension_numbers = #tpu.dot_dimension_numbers<[1], [0], [0], [1], [0, 0, 1, 1], [], []>} : vector<16x16xf32>, vector<16x32xf32>, vector<16x32xf32> -> vector<16x32xf32>
    %67 = vector.broadcast %43 : vector<1x32xf32> to vector<16x32xf32>
    %68 = arith.addf %66, %67 : vector<16x32xf32>
    %cst_42 = arith.constant 0.000000e+00 : f32
    %69 = vector.broadcast %cst_42 : f32 to vector<16x32xf32>
    %70 = arith.maximumf %68, %69 : vector<16x32xf32>
    %c1 = arith.constant 1 : index
    %c0_43 = arith.constant 0 : index
    %c0_44 = arith.constant 0 : index
    %71 = vector.load %arg8[%c1, %c0_43, %c0_44] : memref<3x32x32xf32, #tpu.memory_space<vmem>>, vector<1x32x32xf32>
    %72 = vector.shape_cast %71 : vector<1x32x32xf32> to vector<32x32xf32>
    %c1_45 = arith.constant 1 : index
    %c0_46 = arith.constant 0 : index
    %c0_47 = arith.constant 0 : index
    %73 = vector.load %arg9[%c1_45, %c0_46, %c0_47] : memref<3x1x32xf32, #tpu.memory_space<vmem>>, vector<1x1x32xf32>
    %74 = vector.shape_cast %73 : vector<1x1x32xf32> to vector<1x32xf32>
    %c1_48 = arith.constant 1 : index
    %c0_49 = arith.constant 0 : index
    %c0_50 = arith.constant 0 : index
    %75 = vector.load %arg10[%c1_48, %c0_49, %c0_50] : memref<3x1x32xf32, #tpu.memory_space<vmem>>, vector<1x1x32xf32>
    %76 = vector.shape_cast %75 : vector<1x1x32xf32> to vector<1x32xf32>
    %c1_51 = arith.constant 1 : index
    %c0_52 = arith.constant 0 : index
    %c0_53 = arith.constant 0 : index
    %77 = vector.load %arg11[%c1_51, %c0_52, %c0_53] : memref<3x1x32xf32, #tpu.memory_space<vmem>>, vector<1x1x32xf32>
    %78 = vector.shape_cast %77 : vector<1x1x32xf32> to vector<1x32xf32>
    %c1_54 = arith.constant 1 : index
    %c0_55 = arith.constant 0 : index
    %c0_56 = arith.constant 0 : index
    %79 = vector.load %arg12[%c1_54, %c0_55, %c0_56] : memref<3x1x32xf32, #tpu.memory_space<vmem>>, vector<1x1x32xf32>
    %80 = vector.shape_cast %79 : vector<1x1x32xf32> to vector<1x32xf32>
    %cst_57 = arith.constant dense<0.000000e+00> : vector<16x32xf32>
    %81 = tpu.matmul %70, %72, %cst_57 {dimension_numbers = #tpu.dot_dimension_numbers<[1], [0], [0], [1], [0, 0, 1, 1], [], []>} : vector<16x32xf32>, vector<32x32xf32>, vector<16x32xf32> -> vector<16x32xf32>
    %82 = vector.broadcast %74 : vector<1x32xf32> to vector<16x32xf32>
    %83 = arith.addf %81, %82 : vector<16x32xf32>
    %cst_58 = arith.constant dense<0.000000e+00> : vector<16x1xf32>
    %84 = tpu.matmul %83, %78, %cst_58 {dimension_numbers = #tpu.dot_dimension_numbers<[1], [1], [0], [0], [0, 0, 1, 0], [], []>} : vector<16x32xf32>, vector<1x32xf32>, vector<16x1xf32> -> vector<16x1xf32>
    %cst_59 = arith.constant dense<0.000000e+00> : vector<1x16xf32>
    %85 = tpu.matmul %76, %83, %cst_59 {dimension_numbers = #tpu.dot_dimension_numbers<[1], [1], [0], [0], [0, 0, 1, 0], [], []>} : vector<1x32xf32>, vector<16x32xf32>, vector<1x16xf32> -> vector<1x16xf32>
    %86 = vector.broadcast %84 : vector<16x1xf32> to vector<16x16xf32>
    %87 = vector.broadcast %85 : vector<1x16xf32> to vector<16x16xf32>
    %88 = arith.addf %86, %87 : vector<16x16xf32>
    %cst_60 = arith.constant 2.000000e-01 : f32
    %89 = vector.broadcast %cst_60 : f32 to vector<16x16xf32>
    %90 = arith.mulf %89, %88 : vector<16x16xf32>
    %91 = arith.maximumf %88, %90 : vector<16x16xf32>
    %92 = arith.addf %91, %0 : vector<16x16xf32>
    %cst_61 = arith.constant dense<0xFF800000> : vector<16xf32>
    %93 = vector.multi_reduction <maximumf>, %92, %cst_61 [1] : vector<16x16xf32> to vector<16xf32>
    %94 = vector.shape_cast %93 : vector<16xf32> to vector<16x1xf32>
    %95 = vector.broadcast %94 : vector<16x1xf32> to vector<16x16xf32>
    %96 = arith.subf %92, %95 : vector<16x16xf32>
    %97 = math.exp %96 : vector<16x16xf32>
    %cst_62 = arith.constant dense<0.000000e+00> : vector<16xf32>
    %98 = vector.multi_reduction <add>, %97, %cst_62 [1] : vector<16x16xf32> to vector<16xf32>
    %99 = vector.shape_cast %98 : vector<16xf32> to vector<16x1xf32>
    %100 = tpu.reciprocal %99 {approx = true} : vector<16x1xf32> -> vector<16x1xf32>
    %101 = vector.broadcast %100 : vector<16x1xf32> to vector<16x16xf32>
    %102 = arith.mulf %97, %101 : vector<16x16xf32>
    %cst_63 = arith.constant dense<0.000000e+00> : vector<16x32xf32>
    %103 = tpu.matmul %102, %83, %cst_63 {dimension_numbers = #tpu.dot_dimension_numbers<[1], [0], [0], [1], [0, 0, 1, 1], [], []>} : vector<16x16xf32>, vector<16x32xf32>, vector<16x32xf32> -> vector<16x32xf32>
    %104 = vector.broadcast %80 : vector<1x32xf32> to vector<16x32xf32>
    %105 = arith.addf %103, %104 : vector<16x32xf32>
    %cst_64 = arith.constant 0.000000e+00 : f32
    %106 = vector.broadcast %cst_64 : f32 to vector<16x32xf32>
    %107 = arith.maximumf %105, %106 : vector<16x32xf32>
    %c2 = arith.constant 2 : index
    %c0_65 = arith.constant 0 : index
    %c0_66 = arith.constant 0 : index
    %108 = vector.load %arg8[%c2, %c0_65, %c0_66] : memref<3x32x32xf32, #tpu.memory_space<vmem>>, vector<1x32x32xf32>
    %109 = vector.shape_cast %108 : vector<1x32x32xf32> to vector<32x32xf32>
    %c2_67 = arith.constant 2 : index
    %c0_68 = arith.constant 0 : index
    %c0_69 = arith.constant 0 : index
    %110 = vector.load %arg9[%c2_67, %c0_68, %c0_69] : memref<3x1x32xf32, #tpu.memory_space<vmem>>, vector<1x1x32xf32>
    %111 = vector.shape_cast %110 : vector<1x1x32xf32> to vector<1x32xf32>
    %c2_70 = arith.constant 2 : index
    %c0_71 = arith.constant 0 : index
    %c0_72 = arith.constant 0 : index
    %112 = vector.load %arg10[%c2_70, %c0_71, %c0_72] : memref<3x1x32xf32, #tpu.memory_space<vmem>>, vector<1x1x32xf32>
    %113 = vector.shape_cast %112 : vector<1x1x32xf32> to vector<1x32xf32>
    %c2_73 = arith.constant 2 : index
    %c0_74 = arith.constant 0 : index
    %c0_75 = arith.constant 0 : index
    %114 = vector.load %arg11[%c2_73, %c0_74, %c0_75] : memref<3x1x32xf32, #tpu.memory_space<vmem>>, vector<1x1x32xf32>
    %115 = vector.shape_cast %114 : vector<1x1x32xf32> to vector<1x32xf32>
    %c2_76 = arith.constant 2 : index
    %c0_77 = arith.constant 0 : index
    %c0_78 = arith.constant 0 : index
    %116 = vector.load %arg12[%c2_76, %c0_77, %c0_78] : memref<3x1x32xf32, #tpu.memory_space<vmem>>, vector<1x1x32xf32>
    %117 = vector.shape_cast %116 : vector<1x1x32xf32> to vector<1x32xf32>
    %cst_79 = arith.constant dense<0.000000e+00> : vector<16x32xf32>
    %118 = tpu.matmul %107, %109, %cst_79 {dimension_numbers = #tpu.dot_dimension_numbers<[1], [0], [0], [1], [0, 0, 1, 1], [], []>} : vector<16x32xf32>, vector<32x32xf32>, vector<16x32xf32> -> vector<16x32xf32>
    %119 = vector.broadcast %111 : vector<1x32xf32> to vector<16x32xf32>
    %120 = arith.addf %118, %119 : vector<16x32xf32>
    %cst_80 = arith.constant dense<0.000000e+00> : vector<16x1xf32>
    %121 = tpu.matmul %120, %115, %cst_80 {dimension_numbers = #tpu.dot_dimension_numbers<[1], [1], [0], [0], [0, 0, 1, 0], [], []>} : vector<16x32xf32>, vector<1x32xf32>, vector<16x1xf32> -> vector<16x1xf32>
    %cst_81 = arith.constant dense<0.000000e+00> : vector<1x16xf32>
    %122 = tpu.matmul %113, %120, %cst_81 {dimension_numbers = #tpu.dot_dimension_numbers<[1], [1], [0], [0], [0, 0, 1, 0], [], []>} : vector<1x32xf32>, vector<16x32xf32>, vector<1x16xf32> -> vector<1x16xf32>
    %123 = vector.broadcast %121 : vector<16x1xf32> to vector<16x16xf32>
    %124 = vector.broadcast %122 : vector<1x16xf32> to vector<16x16xf32>
    %125 = arith.addf %123, %124 : vector<16x16xf32>
    %cst_82 = arith.constant 2.000000e-01 : f32
    %126 = vector.broadcast %cst_82 : f32 to vector<16x16xf32>
    %127 = arith.mulf %126, %125 : vector<16x16xf32>
    %128 = arith.maximumf %125, %127 : vector<16x16xf32>
    %129 = arith.addf %128, %0 : vector<16x16xf32>
    %cst_83 = arith.constant dense<0xFF800000> : vector<16xf32>
    %130 = vector.multi_reduction <maximumf>, %129, %cst_83 [1] : vector<16x16xf32> to vector<16xf32>
    %131 = vector.shape_cast %130 : vector<16xf32> to vector<16x1xf32>
    %132 = vector.broadcast %131 : vector<16x1xf32> to vector<16x16xf32>
    %133 = arith.subf %129, %132 : vector<16x16xf32>
    %134 = math.exp %133 : vector<16x16xf32>
    %cst_84 = arith.constant dense<0.000000e+00> : vector<16xf32>
    %135 = vector.multi_reduction <add>, %134, %cst_84 [1] : vector<16x16xf32> to vector<16xf32>
    %136 = vector.shape_cast %135 : vector<16xf32> to vector<16x1xf32>
    %137 = tpu.reciprocal %136 {approx = true} : vector<16x1xf32> -> vector<16x1xf32>
    %138 = vector.broadcast %137 : vector<16x1xf32> to vector<16x16xf32>
    %139 = arith.mulf %134, %138 : vector<16x16xf32>
    %cst_85 = arith.constant dense<0.000000e+00> : vector<16x32xf32>
    %140 = tpu.matmul %139, %120, %cst_85 {dimension_numbers = #tpu.dot_dimension_numbers<[1], [0], [0], [1], [0, 0, 1, 1], [], []>} : vector<16x16xf32>, vector<16x32xf32>, vector<16x32xf32> -> vector<16x32xf32>
    %141 = vector.broadcast %117 : vector<1x32xf32> to vector<16x32xf32>
    %142 = arith.addf %140, %141 : vector<16x32xf32>
    %cst_86 = arith.constant 0.000000e+00 : f32
    %143 = vector.broadcast %cst_86 : f32 to vector<16x32xf32>
    %144 = arith.maximumf %142, %143 : vector<16x32xf32>
    %c0_87 = arith.constant 0 : index
    %c0_88 = arith.constant 0 : index
    %145 = vector.load %arg13[%c0_87, %c0_88] : memref<1x32xf32, #tpu.memory_space<vmem>>, vector<1x32xf32>
    %146 = vector.broadcast %145 : vector<1x32xf32> to vector<16x32xf32>
    %147 = arith.mulf %144, %146 : vector<16x32xf32>
    %c0_89 = arith.constant 0 : index
    %c0_90 = arith.constant 0 : index
    %148 = vector.load %arg14[%c0_89, %c0_90] : memref<1x32xf32, #tpu.memory_space<vmem>>, vector<1x32xf32>
    %149 = vector.broadcast %148 : vector<1x32xf32> to vector<16x32xf32>
    %150 = arith.addf %147, %149 : vector<16x32xf32>
    %c0_91 = arith.constant 0 : index
    %c0_92 = arith.constant 0 : index
    %151 = vector.load %arg2[%c0_91, %c0_92] : memref<2x16xf32, #tpu.memory_space<vmem>>, vector<2x16xf32>
    %cst_93 = arith.constant dense<0.000000e+00> : vector<2x32xf32>
    %152 = tpu.matmul %151, %150, %cst_93 {dimension_numbers = #tpu.dot_dimension_numbers<[1], [0], [0], [1], [0, 0, 1, 1], [], []>} : vector<2x16xf32>, vector<16x32xf32>, vector<2x32xf32> -> vector<2x32xf32>
    %c0_94 = arith.constant 0 : index
    %c0_95 = arith.constant 0 : index
    %153 = vector.load %arg15[%c0_94, %c0_95] : memref<32x32xf32, #tpu.memory_space<vmem>>, vector<32x32xf32>
    %cst_96 = arith.constant dense<0.000000e+00> : vector<2x32xf32>
    %154 = tpu.matmul %152, %153, %cst_96 {dimension_numbers = #tpu.dot_dimension_numbers<[1], [0], [0], [1], [0, 0, 1, 1], [], []>} : vector<2x32xf32>, vector<32x32xf32>, vector<2x32xf32> -> vector<2x32xf32>
    %c0_97 = arith.constant 0 : index
    %c0_98 = arith.constant 0 : index
    %155 = vector.load %arg16[%c0_97, %c0_98] : memref<1x32xf32, #tpu.memory_space<vmem>>, vector<1x32xf32>
    %156 = vector.broadcast %155 : vector<1x32xf32> to vector<2x32xf32>
    %157 = arith.addf %154, %156 : vector<2x32xf32>
    %cst_99 = arith.constant 0.000000e+00 : f32
    %158 = vector.broadcast %cst_99 : f32 to vector<2x32xf32>
    %159 = arith.maximumf %157, %158 : vector<2x32xf32>
    %c0_100 = arith.constant 0 : index
    %c0_101 = arith.constant 0 : index
    %160 = vector.load %arg17[%c0_100, %c0_101] : memref<32x16xf32, #tpu.memory_space<vmem>>, vector<32x16xf32>
    %cst_102 = arith.constant dense<0.000000e+00> : vector<2x16xf32>
    %161 = tpu.matmul %159, %160, %cst_102 {dimension_numbers = #tpu.dot_dimension_numbers<[1], [0], [0], [1], [0, 0, 1, 1], [], []>} : vector<2x32xf32>, vector<32x16xf32>, vector<2x16xf32> -> vector<2x16xf32>
    %c0_103 = arith.constant 0 : index
    %c0_104 = arith.constant 0 : index
    %162 = vector.load %arg18[%c0_103, %c0_104] : memref<1x16xf32, #tpu.memory_space<vmem>>, vector<1x16xf32>
    %163 = vector.broadcast %162 : vector<1x16xf32> to vector<2x16xf32>
    %164 = arith.addf %161, %163 : vector<2x16xf32>
    %cst_105 = arith.constant 0.000000e+00 : f32
    %165 = vector.broadcast %cst_105 : f32 to vector<2x16xf32>
    %166 = arith.maximumf %164, %165 : vector<2x16xf32>
    %c0_106 = arith.constant 0 : index
    %c0_107 = arith.constant 0 : index
    %167 = vector.load %arg19[%c0_106, %c0_107] : memref<16x4xf32, #tpu.memory_space<vmem>>, vector<16x4xf32>
    %cst_108 = arith.constant dense<0.000000e+00> : vector<2x4xf32>
    %168 = tpu.matmul %166, %167, %cst_108 {dimension_numbers = #tpu.dot_dimension_numbers<[1], [0], [0], [1], [0, 0, 1, 1], [], []>} : vector<2x16xf32>, vector<16x4xf32>, vector<2x4xf32> -> vector<2x4xf32>
    %c0_109 = arith.constant 0 : index
    %c0_110 = arith.constant 0 : index
    %169 = vector.load %arg20[%c0_109, %c0_110] : memref<1x4xf32, #tpu.memory_space<vmem>>, vector<1x4xf32>
    %170 = vector.broadcast %169 : vector<1x4xf32> to vector<2x4xf32>
    %171 = arith.addf %168, %170 : vector<2x4xf32>
    %c0_111 = arith.constant 0 : index
    %c0_112 = arith.constant 0 : index
    %172 = vector.load %arg21[%c0_111, %c0_112] : memref<2x4xf32, #tpu.memory_space<vmem>>, vector<2x4xf32>
    tpu.vector_store %arg21[%c0_111, %c0_112], %171 {strides = array<i32>} : memref<2x4xf32, #tpu.memory_space<vmem>>, vector<2x4xf32>,
    return
  }
}

</mosaic_0001>

<bundles_post_ra>
// kernel: gat_forward.1
= control target key start
LH: loop header
LB: loop body
LE: loop exit
PB: predicated region body
PF: predicated region fallthrough
CT: control target
= control target key end

     0   :  { %s2458_s0 = inlined_call_operand.vmem [shape: f32[16,8], index: 0, kind: input, shape index: {}]   ;;  %s2459_s1 = inlined_call_operand.vmem [shape: f32[16,16], index: 1, kind: input, shape index: {}]   ;;  %s2460_s2 = inlined_call_operand.vmem [shape: f32[2,16], index: 2, kind: input, shape index: {}]   ;;  %s2461_s3 = inlined_call_operand.vmem [shape: f32[8,32], index: 3, kind: input, shape index: {}]   ;;  %s2462_s4 = inlined_call_operand.vmem [shape: f32[1,32], index: 4, kind: input, shape index: {}]   ;;  %s2463_s5 = inlined_call_operand.vmem [shape: f32[1,32], index: 5, kind: input, shape index: {}]   ;;  %s2464_s6 = inlined_call_operand.vmem [shape: f32[1,32], index: 6, kind: input, shape index: {}]   ;;  %s2465_s7 = inlined_call_operand.vmem [shape: f32[1,32], index: 7, kind: input, shape index: {}]   ;;  %s2466_s8 = inlined_call_operand.vmem [shape: f32[3,32,32], index: 8, kind: input, shape index: {}]   ;;  %s2467_s9 = inlined_call_operand.vmem [shape: f32[3,1,32], index: 9, kind: input, shape index: {}]   ;;  %s2468_s10 = inlined_call_operand.vmem [shape: f32[3,1,32], index: 10, kind: input, shape index: {}]   ;;  %s2469_s11 = inlined_call_operand.vmem [shape: f32[3,1,32], index: 11, kind: input, shape index: {}]   ;;  %s2470_s12 = inlined_call_operand.vmem [shape: f32[3,1,32], index: 12, kind: input, shape index: {}]   ;;  %s2471_s13 = inlined_call_operand.vmem [shape: f32[1,32], index: 13, kind: input, shape index: {}]   ;;  %s2472_s14 = inlined_call_operand.vmem [shape: f32[1,32], index: 14, kind: input, shape index: {}]   ;;  %s2473_s15 = inlined_call_operand.vmem [shape: f32[32,32], index: 15, kind: input, shape index: {}]   ;;  %s2474_s16 = inlined_call_operand.vmem [shape: f32[1,32], index: 16, kind: input, shape index: {}]   ;;  %s2475_s17 = inlined_call_operand.vmem [shape: f32[32,16], index: 17, kind: input, shape index: {}]   ;;  %s2476_s18 = inlined_call_operand.vmem [shape: f32[1,16], index: 18, kind: input, shape index: {}]   ;;  %s2477_s19 = inlined_call_operand.vmem [shape: f32[16,4], index: 19, kind: input, shape index: {}]   ;;  %s2478_s20 = inlined_call_operand.vmem [shape: f32[1,4], index: 20, kind: input, shape index: {}]   ;;  %s2479_s21 = inlined_call_operand.hbm [shape: f32[2,4], index: 21, kind: output, shape index: {}]  }
   0x1   :  { %2482 = sst [smem:[#allocation5_spill]] %s2458_s0 }
   0x2   :  { %2483 = sst [smem:[#allocation6_spill]] %s2459_s1 }
   0x3   :  { %2484 = sst [smem:[#allocation7_spill]] %s2460_s2 }
   0x4   :  { %2485 = sst [smem:[#allocation8_spill]] %s2461_s3 }
   0x5   :  { %2486 = sst [smem:[#allocation9_spill]] %s2462_s4 }
   0x6   :  { %2487 = sst [smem:[#allocation10_spill]] %s2463_s5 }
   0x7   :  { %2488 = sst [smem:[#allocation11_spill]] %s2474_s16 }
   0x8   :  { %s2489_s26 = sld [smem:[#allocation8_spill]]  ;;  %s2490_s16 = sld [smem:[#allocation5_spill]]  ;;  %vm84_vm0 = vcmask 64512  }
   0xe   :  { %v73_v0 = vld [vmem:[%s2489_s26] sm:$0xff]  ;;  %v72_v2 = vld [vmem:[%s2490_s16 + $0x8] sm:$0xff] }
   0xf   :  { %v71_v1 = vld [vmem:[%s2490_s16] sm:$0xff]  ;;  %1817 = vmatprep.subr.mxu0 %v73_v0 }
  0x10   :  { %1819 = vmatprep.mubr.msk.f32.mxu0 %vm84_vm0, %v71_v1 }
  0x11   :  { %26 = vsyncpa [#allocation3], 0  ;;  %1818 = vmatpush3.msra.mxu0 %v73_v0  ;;  %v2081_v3 = vmov 0.0|0.0   ;;  %vm2082_vm1 = vmmov 0   ;;  %v2083_v4 = vmov 0.0   ;;  %s2491_s30 = sld [smem:[#allocation9_spill]]  ;;  %v260_v18 = vlaneseq }
  0x12   :  { %1820 = vmatmul.mubr.msk.f32.vlgmr.msra.gmra.mrb[0].mxu0 %vm84_vm0, %v72_v2  ;;  %1947 = vmatprep.subr.bf16.mxu1 %v2081_v3  ;;  %vm174_vm2 = vcmask 261120   ;;  %v1690_v9 = vld [vmem:[%s2464_s6] ss:$0 sm:$0xff]  ;;  %s2494_s23 = sld [smem:[#allocation10_spill]]  ;;  %s2495_s2 = sld [smem:[#allocation6_spill]]  ;;  %vm272_vm4 = vcmask 130048  }
  0x13   :  { %1826 = vmatprep.mubr.msk.f32.mxu1 %vm2082_vm1, %v2083_v4  ;;  %vm2215_vm3 = vmpackc.low %vm174_vm2, %vm174_vm2  ;;  %v261_v19 = vshrl.u32 %v260_v18, 7  ;;  %v384_v48 = vld [vmem:[%s2466_s8] sm:$0xff]  ;;  %v385_v49 = vld [vmem:[%s2466_s8 + $0x8] sm:$0xff]  ;;  %s2496_s0 = sld [smem:[#allocation7_spill]]  ;;  %s2497_s6 = sld [smem:[#allocation11_spill]]  ;;  %vm1671_vm5 = vcmask 25600  }
  0x14   :  { %v1955_v50 = vpack.c.bf16 %v385_v49, %v384_v48  ;;  %v386_v57 = vld [vmem:[%s2466_s8 + $0x10] sm:$0xff]  ;;  %v387_v58 = vld [vmem:[%s2466_s8 + $0x18] sm:$0xff]  ;;  %v1694_v60 = vld [vmem:[%s2465_s7] ss:$0 sm:$0xff]  ;;  %s2084_s26 = smov [#allocation2]  }
  0x15   :  { %v2230_v21 = vsub.s32 0, %v261_v19  ;;  %v1959_v59 = vpack.c.bf16 %v387_v58, %v386_v57  ;;  %v1704_v58 = vld [vmem:[%s2470_s12] ss:$0 sm:$0xff]  ;;  %s1679_s27 = sshll.u32 %s2084_s26, 4  ;;  %s1680_s27 = int_to_ptr.vmem [resolvable:$true] %s1679_s27 }
  0x16   :  { %p2062_p1 = scmp.lt.s32.totalorder %s1680_s27, %s1680_s27 }
  0x17   :  { %v1687_v5 = vld [vmem:[%s2491_s30] ss:$0 sm:$0xff] }
  0x18   :  { %v75_v17 = vld [vmem:[%s2494_s23] sm:$0x1]  ;;  %v2241_v33 = vld [vmem:[%s2495_s2 + $0x8] sm:$0xff] }
  0x19   :  { %v2236_v30 = vld [vmem:[%s2495_s2] sm:$0xff] }
  0xe5   :  { %v1821_v6 = vpop.f32.mrb[0].mxu0 }
  0xe6   :  { %v163_v7 = vadd.f32 %v1821_v6, %v1687_v5  ;;  %v157_v8 = vpop.f32.mrb[1].mxu0 }
  0xe7   :  { %v158_v10 = vadd.f32 %v1687_v5, %v157_v8  ;;  %v1697_v5 = vld [vmem:[%s2467_s9] ss:$0 sm:$0xff] }
  0xe8   :  { %v173_v15 = vmul.f32 %v1690_v9, %v163_v7 }
  0xe9   :  { %v1948_v12 = vpack.c.bf16 %v163_v7, %v158_v10  ;;  %v172_v13 = vmul.f32 %v1690_v9, %v158_v10  ;;  %v1700_v7 = vld [vmem:[%s2469_s11] ss:$0 sm:$0xff] }
  0xea   :  { %v178_v16 = vsel %vm174_vm2, %v173_v15, 0.0 }
  0xeb   :  { %1950 = vmatpush3.bf16.xpose.msk.msra.mxu1 %vm2215_vm3, %v1948_v12  ;;  %1952 = vmatprep.subr.bf16.mxu0 %v1948_v12  ;;  %v175_v14 = vsel %vm174_vm2, %v172_v13, 0.0 }
  0xec   :  { %1954 = vmatpush3.bf16.msra.mxu0 %v1948_v12  ;;  %176 = vadd.xlane.f32.xlu0 %v175_v14 }
  0xed   :  { %1963 = vmatprep.subr.bf16.mxu1 %v2081_v3  ;;  %1956 = vmatprep.subr.bf16.mxu0 %v1955_v50 }
  0xf0   :  { %179 = vadd.xlane.f32.xlu0 %v178_v16 }
  0xf2   :  { %1827 = vmatmul.mubr.msk.f32.vlgmr.msra.gmra.mrb[0].mxu1 %vm174_vm2, %v75_v17  ;;  %v389_v17 = vld [vmem:[%s2468_s10] sm:$0x1] }
  0xf3   :  { %1851 = vmatprep.mubr.msk.f32.mxu1 %vm2082_vm1, %v2083_v4 }
 0x179   :  { %v177_v20 = vpop.xlane.xlu0 %176 }
 0x17d   :  { %v180_v25 = vpop.xlane.xlu0 %179 }
 0x1c5   :  { %v256_v22 = vpop.f32.mrb[0].mxu1 }
 0x1c6   :  { %v263_v23 = vrot.slane %v256_v22, %v2230_v21  ;;  %v1828_v24 = vpop.f32.mrb[1].mxu1 }
 0x1c8   :  { %v264_v26 = vadd.f32 %v263_v23, %v177_v20  ;;  %v265_v27 = vadd.f32 %v263_v23, %v180_v25 }
 0x1ca   :  { %v266_v28 = vmul.f32 0.2, %v264_v26  ;;  %v267_v29 = vmul.f32 0.2, %v265_v27 }
 0x1cc   :  { %v268_v31 = vmax.f32 %v264_v26, %v266_v28  ;;  %v269_v32 = vmax.f32 %v265_v27, %v267_v29 }
 0x1ce   :  { %v270_v34 = vadd.f32 %v268_v31, %v2236_v30  ;;  %v271_v36 = vadd.f32 %v269_v32, %v2241_v33 }
 0x1d0   :  { %v273_v35 = vsel %vm272_vm4, %v270_v34, -inf  ;;  %v276_v37 = vsel %vm272_vm4, %v271_v36, -inf }
 0x1d1   :  { %274 = vmax.xlane.f32.xlu1 %v273_v35 }
 0x1d5   :  { %277 = vmax.xlane.f32.xlu1 %v276_v37 }
 0x25e   :  { %v275_v38 = vpop.xlane.xlu1 %274 }
 0x25f   :  { %v279_v39 = vsub.f32 %v270_v34, %v275_v38 }
 0x261   :  { %v281_v40 = vmul.f32 1.442695, %v279_v39 }
 0x262   :  { %v278_v41 = vpop.xlane.xlu1 %277 }
 0x263   :  { %2025 = vpow2.f32 %v281_v40  ;;  %v280_v42 = vsub.f32 %v271_v36, %v278_v41 }
 0x265   :  { %v283_v43 = vmul.f32 1.442695, %v280_v42 }
 0x267   :  { %2027 = vpow2.f32 %v283_v43 }
 0x26d   :  { %v2026_v44 = vpop.eup %2025 }
 0x26e   :  { %v285_v45 = vsel %vm272_vm4, %v2026_v44, 0.0 }
 0x26f   :  { %286 = vadd.xlane.f32.xlu0 %v285_v45 }
 0x271   :  { %v2028_v46 = vpop.eup %2027 }
 0x272   :  { %v288_v47 = vsel %vm272_vm4, %v2028_v46, 0.0 }
 0x273   :  { %289 = vadd.xlane.f32.xlu1 %v288_v47  ;;  %v1708_v47 = vld [vmem:[%s2466_s8 + $0x28] sm:$0xff] }
 0x2fc   :  { %v287_v51 = vpop.xlane.xlu0 %286 }
 0x2fd   :  { %2029 = vrcp.f32 %v287_v51 }
 0x300   :  { %v290_v52 = vpop.xlane.xlu1 %289 }
 0x301   :  { %2031 = vrcp.f32 %v290_v52 }
 0x307   :  { %v2030_v53 = vpop.eup %2029 }
 0x308   :  { %v293_v54 = vmul.f32 %v2030_v53, %v2026_v44 }
 0x30a   :  { %1833 = vmatprep.mubr.msk.f32.mxu0 %vm272_vm4, %v293_v54 }
 0x30b   :  { %v2032_v55 = vpop.eup %2031 }
 0x30c   :  { %v294_v56 = vmul.f32 %v2032_v55, %v2028_v46  ;;  %v1707_v46 = vld [vmem:[%s2466_s8 + $0x20] sm:$0xff]  ;;  %v1709_v55 = vld [vmem:[%s2466_s8 + $0x30] sm:$0xff] }
 0x30d   :  { %v1971_v48 = vpack.c.bf16 %v1708_v47, %v1707_v46 }
 0x30e   :  { %1834 = vmatmul.mubr.msk.f32.vlgmr.msra.gmra.mrb[2].mxu0 %vm272_vm4, %v294_v56  ;;  %v1710_v56 = vld [vmem:[%s2466_s8 + $0x38] sm:$0xff] }
 0x30f   :  { %1958 = vmatpush3.bf16.msra.mxu0 %v1955_v50  ;;  %v1975_v57 = vpack.c.bf16 %v1710_v56, %v1709_v55  ;;  %v1722_v56 = vld [vmem:[%s2470_s12 + $0x1] ss:$0 sm:$0xff] }
 0x310   :  { %1960 = vmatprep.subr.bf16.mxu0 %v1959_v59 }
 0x313   :  { %1962 = vmatpush3.bf16.msra.mxu0 %v1959_v59 }
 0x3e1   :  { %v1835_v61 = vpop.f32.mrb[2].mxu0 }
 0x3e2   :  { %v379_v62 = vadd.f32 %v1835_v61, %v1694_v60  ;;  %v373_v63 = vpop.f32.mrb[3].mxu0 }
 0x3e3   :  { %v374_v0 = vadd.f32 %v1694_v60, %v373_v63 }
 0x3e4   :  { %v383_v2 = vmax.f32 %v379_v62, 0.0 }
 0x3e5   :  { %v382_v1 = vmax.f32 %v374_v0, 0.0 }
 0x3e7   :  { %1844 = vmatprep.mubr.msk.f32.mxu0 %vm174_vm2, %v382_v1  ;;  %v1715_v1 = vld [vmem:[%s2467_s9 + $0x1] ss:$0 sm:$0xff] }
 0x3e8   :  { %1845 = vmatmul.mubr.msk.f32.vlgmr.msra.gmra.mrb[4].mxu0 %vm174_vm2, %v383_v2 }
 0x4bb   :  { %v1846_v6 = vpop.f32.mrb[4].mxu0 }
 0x4bc   :  { %v476_v8 = vadd.f32 %v1846_v6, %v1697_v5  ;;  %v470_v9 = vpop.f32.mrb[5].mxu0 }
 0x4bd   :  { %v471_v10 = vadd.f32 %v1697_v5, %v470_v9  ;;  %v1718_v5 = vld [vmem:[%s2469_s11 + $0x1] ss:$0 sm:$0xff] }
 0x4be   :  { %v486_v12 = vmul.f32 %v1700_v7, %v476_v8 }
 0x4bf   :  { %v1964_v13 = vpack.c.bf16 %v476_v8, %v471_v10  ;;  %v485_v14 = vmul.f32 %v1700_v7, %v471_v10 }
 0x4c0   :  { %v490_v15 = vsel %vm174_vm2, %v486_v12, 0.0 }
 0x4c1   :  { %491 = vadd.xlane.f32.xlu1 %v490_v15  ;;  %1966 = vmatpush3.bf16.xpose.msk.msra.mxu1 %vm2215_vm3, %v1964_v13  ;;  %v487_v16 = vsel %vm174_vm2, %v485_v14, 0.0  ;;  %v1712_v15 = vld [vmem:[%s2468_s10 + $0x1] sm:$0x1] }
 0x4c2   :  { %1968 = vmatprep.subr.bf16.mxu0 %v1964_v13  ;;  %488 = vadd.xlane.f32.xlu0 %v487_v16 }
 0x4c3   :  { %1970 = vmatpush3.bf16.msra.mxu0 %v1964_v13  ;;  %1972 = vmatprep.subr.bf16.mxu1 %v1971_v48 }
 0x4c4   :  { %1979 = vmatprep.subr.bf16.mxu0 %v2081_v3 }
 0x4c8   :  { %1852 = vmatmul.mubr.msk.f32.vlgmr.msra.gmra.mrb[2].mxu1 %vm174_vm2, %v389_v17 }
 0x4c9   :  { %1974 = vmatpush3.bf16.msra.mxu1 %v1971_v48 }
 0x4ca   :  { %1976 = vmatprep.subr.bf16.mxu1 %v1975_v57 }
 0x4cd   :  { %1978 = vmatpush3.bf16.msra.mxu1 %v1975_v57 }
 0x54e   :  { %v492_v22 = vpop.xlane.xlu1 %491 }
 0x54f   :  { %v489_v23 = vpop.xlane.xlu0 %488 }
 0x59b   :  { %v568_v18 = vpop.f32.mrb[2].mxu1 }
 0x59c   :  { %v575_v19 = vrot.slane %v568_v18, %v2230_v21  ;;  %v1853_v20 = vpop.f32.mrb[3].mxu1 }
 0x59e   :  { %v576_v24 = vadd.f32 %v575_v19, %v489_v23  ;;  %v577_v25 = vadd.f32 %v575_v19, %v492_v22 }
 0x5a0   :  { %v578_v26 = vmul.f32 0.2, %v576_v24  ;;  %v579_v27 = vmul.f32 0.2, %v577_v25 }
 0x5a2   :  { %v581_v28 = vmax.f32 %v577_v25, %v579_v27  ;;  %v580_v29 = vmax.f32 %v576_v24, %v578_v26 }
 0x5a4   :  { %v583_v31 = vadd.f32 %v581_v28, %v2241_v33  ;;  %v582_v32 = vadd.f32 %v580_v29, %v2236_v30 }
 0x5a6   :  { %v587_v34 = vsel %vm272_vm4, %v583_v31, -inf  ;;  %v584_v35 = vsel %vm272_vm4, %v582_v32, -inf }
 0x5a7   :  { %588 = vmax.xlane.f32.xlu1 %v587_v34  ;;  %585 = vmax.xlane.f32.xlu0 %v584_v35 }
 0x634   :  { %v589_v36 = vpop.xlane.xlu1 %588  ;;  %v586_v37 = vpop.xlane.xlu0 %585 }
 0x635   :  { %v591_v38 = vsub.f32 %v583_v31, %v589_v36  ;;  %v590_v39 = vsub.f32 %v582_v32, %v586_v37 }
 0x637   :  { %v594_v40 = vmul.f32 1.442695, %v591_v38  ;;  %v592_v41 = vmul.f32 1.442695, %v590_v39 }
 0x639   :  { %2033 = vpow2.f32 %v594_v40 }
 0x63a   :  { %2035 = vpow2.f32 %v592_v41 }
 0x643   :  { %v2034_v42 = vpop.eup %2033 }
 0x644   :  { %v2036_v43 = vpop.eup %2035  ;;  %v599_v44 = vsel %vm272_vm4, %v2034_v42, 0.0 }
 0x645   :  { %600 = vadd.xlane.f32.xlu1 %v599_v44  ;;  %v596_v45 = vsel %vm272_vm4, %v2036_v43, 0.0  ;;  %v1725_v44 = vld [vmem:[%s2466_s8 + $0x40] sm:$0xff] }
 0x646   :  { %597 = vadd.xlane.f32.xlu0 %v596_v45  ;;  %v1726_v45 = vld [vmem:[%s2466_s8 + $0x48] sm:$0xff] }
 0x647   :  { %v1987_v46 = vpack.c.bf16 %v1726_v45, %v1725_v44  ;;  %v1419_v44 = vld [vmem:[%s2473_s15] sm:$0xff]  ;;  %v1420_v45 = vld [vmem:[%s2473_s15 + $0x8] sm:$0xff] }
 0x6d2   :  { %v601_v49 = vpop.xlane.xlu1 %600 }
 0x6d3   :  { %2037 = vrcp.f32 %v601_v49  ;;  %v598_v50 = vpop.xlane.xlu0 %597 }
 0x6d4   :  { %2039 = vrcp.f32 %v598_v50 }
 0x6dd   :  { %v2038_v51 = vpop.eup %2037 }
 0x6de   :  { %v2040_v52 = vpop.eup %2039  ;;  %v605_v53 = vmul.f32 %v2038_v51, %v2034_v42 }
 0x6df   :  { %v604_v54 = vmul.f32 %v2040_v52, %v2036_v43 }
 0x6e1   :  { %1858 = vmatprep.mubr.msk.f32.mxu0 %vm272_vm4, %v604_v54  ;;  %v1728_v54 = vld [vmem:[%s2466_s8 + $0x58] sm:$0xff] }
 0x6e2   :  { %1859 = vmatmul.mubr.msk.f32.vlgmr.msra.gmra.mrb[6].mxu0 %vm272_vm4, %v605_v53  ;;  %v1727_v53 = vld [vmem:[%s2466_s8 + $0x50] sm:$0xff] }
 0x6e3   :  { %1876 = vmatprep.mubr.msk.f32.mxu0 %vm2082_vm1, %v2083_v4  ;;  %v1991_v55 = vpack.c.bf16 %v1728_v54, %v1727_v53  ;;  %v1743_v54 = vld [vmem:[%s2471_s13] ss:$0 sm:$0xff] }
 0x7b5   :  { %v1860_v59 = vpop.f32.mrb[6].mxu0 }
 0x7b6   :  { %v690_v60 = vadd.f32 %v1860_v59, %v1704_v58  ;;  %v684_v61 = vpop.f32.mrb[7].mxu0 }
 0x7b7   :  { %v685_v62 = vadd.f32 %v1704_v58, %v684_v61 }
 0x7b8   :  { %v694_v0 = vmax.f32 %v690_v60, 0.0 }
 0x7b9   :  { %v693_v63 = vmax.f32 %v685_v62, 0.0 }
 0x7bb   :  { %1869 = vmatprep.mubr.msk.f32.mxu1 %vm174_vm2, %v693_v63  ;;  %v1733_v63 = vld [vmem:[%s2467_s9 + $0x2] ss:$0 sm:$0xff] }
 0x7bc   :  { %1870 = vmatmul.mubr.msk.f32.vlgmr.msra.gmra.mrb[4].mxu1 %vm174_vm2, %v694_v0 }
 0x88f   :  { %v1871_v2 = vpop.f32.mrb[4].mxu1 }
 0x890   :  { %v792_v6 = vadd.f32 %v1871_v2, %v1715_v1  ;;  %v786_v7 = vpop.f32.mrb[5].mxu1 }
 0x891   :  { %v787_v8 = vadd.f32 %v1715_v1, %v786_v7  ;;  %v1736_v1 = vld [vmem:[%s2469_s11 + $0x2] ss:$0 sm:$0xff] }
 0x892   :  { %v802_v9 = vmul.f32 %v1718_v5, %v792_v6 }
 0x893   :  { %v1980_v10 = vpack.c.bf16 %v792_v6, %v787_v8  ;;  %v801_v12 = vmul.f32 %v1718_v5, %v787_v8 }
 0x894   :  { %v806_v13 = vsel %vm174_vm2, %v802_v9, 0.0 }
 0x895   :  { %807 = vadd.xlane.f32.xlu1 %v806_v13  ;;  %1982 = vmatpush3.bf16.xpose.msk.msra.mxu0 %vm2215_vm3, %v1980_v10  ;;  %v803_v14 = vsel %vm174_vm2, %v801_v12, 0.0  ;;  %v1730_v13 = vld [vmem:[%s2468_s10 + $0x2] sm:$0x1] }
 0x896   :  { %1984 = vmatprep.subr.bf16.mxu1 %v1980_v10  ;;  %804 = vadd.xlane.f32.xlu0 %v803_v14 }
 0x897   :  { %1986 = vmatpush3.bf16.msra.mxu1 %v1980_v10  ;;  %1988 = vmatprep.subr.bf16.mxu0 %v1987_v46 }
 0x898   :  { %1995 = vmatprep.subr.bf16.mxu1 %v2081_v3 }
 0x89c   :  { %1877 = vmatmul.mubr.msk.f32.vlgmr.msra.gmra.mrb[8].mxu0 %vm174_vm2, %v1712_v15 }
 0x89d   :  { %1990 = vmatpush3.bf16.msra.mxu0 %v1987_v46  ;;  %v1421_v46 = vld [vmem:[%s2473_s15 + $0x10] sm:$0xff] }
 0x89e   :  { %1992 = vmatprep.subr.bf16.mxu0 %v1991_v55 }
 0x8a1   :  { %1994 = vmatpush3.bf16.msra.mxu0 %v1991_v55 }
 0x922   :  { %v808_v19 = vpop.xlane.xlu1 %807 }
 0x923   :  { %v805_v20 = vpop.xlane.xlu0 %804 }
 0x96f   :  { %v884_v16 = vpop.f32.mrb[8].mxu0 }
 0x970   :  { %v891_v17 = vrot.slane %v884_v16, %v2230_v21  ;;  %v1878_v18 = vpop.f32.mrb[9].mxu0 }
 0x972   :  { %v892_v22 = vadd.f32 %v891_v17, %v805_v20  ;;  %v893_v23 = vadd.f32 %v891_v17, %v808_v19 }
 0x974   :  { %v894_v24 = vmul.f32 0.2, %v892_v22  ;;  %v895_v25 = vmul.f32 0.2, %v893_v23 }
 0x976   :  { %v897_v26 = vmax.f32 %v893_v23, %v895_v25  ;;  %v896_v27 = vmax.f32 %v892_v22, %v894_v24 }
 0x978   :  { %v899_v28 = vadd.f32 %v897_v26, %v2241_v33  ;;  %v898_v29 = vadd.f32 %v896_v27, %v2236_v30 }
 0x97a   :  { %v903_v31 = vsel %vm272_vm4, %v899_v28, -inf  ;;  %v900_v32 = vsel %vm272_vm4, %v898_v29, -inf }
 0x97b   :  { %904 = vmax.xlane.f32.xlu1 %v903_v31  ;;  %901 = vmax.xlane.f32.xlu0 %v900_v32 }
 0xa08   :  { %v905_v34 = vpop.xlane.xlu1 %904  ;;  %v902_v35 = vpop.xlane.xlu0 %901 }
 0xa09   :  { %v907_v36 = vsub.f32 %v899_v28, %v905_v34  ;;  %v906_v37 = vsub.f32 %v898_v29, %v902_v35 }
 0xa0b   :  { %v910_v38 = vmul.f32 1.442695, %v907_v36  ;;  %v908_v39 = vmul.f32 1.442695, %v906_v37 }
 0xa0d   :  { %2041 = vpow2.f32 %v910_v38 }
 0xa0e   :  { %2043 = vpow2.f32 %v908_v39 }
 0xa17   :  { %v2042_v40 = vpop.eup %2041 }
 0xa18   :  { %v2044_v41 = vpop.eup %2043  ;;  %v915_v42 = vsel %vm272_vm4, %v2042_v40, 0.0 }
 0xa19   :  { %916 = vadd.xlane.f32.xlu1 %v915_v42  ;;  %v912_v43 = vsel %vm272_vm4, %v2044_v41, 0.0 }
 0xa1a   :  { %913 = vadd.xlane.f32.xlu0 %v912_v43 }
 0xaa6   :  { %v917_v47 = vpop.xlane.xlu1 %916 }
 0xaa7   :  { %2045 = vrcp.f32 %v917_v47  ;;  %v914_v48 = vpop.xlane.xlu0 %913  ;;  %v2007_v47 = vpack.c.bf16 %v1420_v45, %v1419_v44 }
 0xaa8   :  { %2047 = vrcp.f32 %v914_v48  ;;  %v1422_v48 = vld [vmem:[%s2473_s15 + $0x18] sm:$0xff] }
 0xab1   :  { %v2046_v49 = vpop.eup %2045 }
 0xab2   :  { %v2048_v50 = vpop.eup %2047  ;;  %v921_v51 = vmul.f32 %v2046_v49, %v2042_v40  ;;  %v2010_v49 = vpack.c.bf16 %v1422_v48, %v1421_v46 }
 0xab3   :  { %v920_v52 = vmul.f32 %v2048_v50, %v2044_v41  ;;  %v1740_v50 = vld [vmem:[%s2470_s12 + $0x2] ss:$0 sm:$0xff] }
 0xab5   :  { %1883 = vmatprep.mubr.msk.f32.mxu1 %vm272_vm4, %v920_v52 }
 0xab6   :  { %1884 = vmatmul.mubr.msk.f32.vlgmr.msra.gmra.mrb[6].mxu1 %vm272_vm4, %v921_v51 }
 0xab7   :  { %1901 = vmatprep.mubr.msk.f32.mxu1 %vm2082_vm1, %v2083_v4 }
 0xb89   :  { %v1885_v57 = vpop.f32.mrb[6].mxu1 }
 0xb8a   :  { %v1006_v58 = vadd.f32 %v1885_v57, %v1722_v56  ;;  %v1000_v59 = vpop.f32.mrb[7].mxu1  ;;  %v1744_v57 = vld [vmem:[%s2472_s14] ss:$0 sm:$0xff] }
 0xb8b   :  { %v1001_v60 = vadd.f32 %v1722_v56, %v1000_v59 }
 0xb8c   :  { %v1010_v62 = vmax.f32 %v1006_v58, 0.0 }
 0xb8d   :  { %v1009_v61 = vmax.f32 %v1001_v60, 0.0 }
 0xb8f   :  { %1894 = vmatprep.mubr.msk.f32.mxu0 %vm174_vm2, %v1009_v61 }
 0xb90   :  { %1895 = vmatmul.mubr.msk.f32.vlgmr.msra.gmra.mrb[10].mxu0 %vm174_vm2, %v1010_v62 }
 0xc63   :  { %v1896_v0 = vpop.f32.mrb[10].mxu0 }
 0xc64   :  { %v1108_v2 = vadd.f32 %v1896_v0, %v1733_v63  ;;  %v1102_v5 = vpop.f32.mrb[11].mxu0  ;;  %v1345_v0 = vld [vmem:[%s2496_s0] sm:$0x3] }
 0xc65   :  { %v1103_v6 = vadd.f32 %v1733_v63, %v1102_v5 }
 0xc66   :  { %v1118_v7 = vmul.f32 %v1736_v1, %v1108_v2 }
 0xc67   :  { %v1996_v8 = vpack.c.bf16 %v1108_v2, %v1103_v6  ;;  %v1117_v9 = vmul.f32 %v1736_v1, %v1103_v6  ;;  %v1504_v1 = vld [vmem:[%s2475_s17] sm:$0xff]  ;;  %v1505_v2 = vld [vmem:[%s2475_s17 + $0x8] sm:$0xff] }
 0xc68   :  { %v1122_v10 = vsel %vm174_vm2, %v1118_v7, 0.0  ;;  %v2013_v5 = vpack.c.bf16 %v1505_v2, %v1504_v1 }
 0xc69   :  { %1123 = vadd.xlane.f32.xlu1 %v1122_v10  ;;  %1998 = vmatpush3.bf16.xpose.msk.msra.mxu1 %vm2215_vm3, %v1996_v8  ;;  %v1119_v12 = vsel %vm174_vm2, %v1117_v9, 0.0  ;;  %v1507_v9 = vld [vmem:[%s2475_s17 + $0x18] sm:$0xff] }
 0xc6a   :  { %2000 = vmatprep.subr.bf16.mxu0 %v1996_v8  ;;  %1120 = vadd.xlane.f32.xlu0 %v1119_v12 }
 0xc6b   :  { %2002 = vmatpush3.bf16.msra.mxu0 %v1996_v8  ;;  %2003 = vmatprep.subr.bf16.mxu1 %v2081_v3  ;;  %v1506_v8 = vld [vmem:[%s2475_s17 + $0x10] sm:$0xff] }
 0xc6c   :  { %2006 = vmatprep.subr.bf16.mxu0 %v2081_v3  ;;  %v2016_v10 = vpack.c.bf16 %v1507_v9, %v1506_v8 }
 0xc70   :  { %1902 = vmatmul.mubr.msk.f32.vlgmr.msra.gmra.mrb[8].mxu1 %vm174_vm2, %v1730_v13 }
 0xc71   :  { %1915 = vmatprep.mubr.msk.f32.mxu1 %vm2082_vm1, %v2083_v4 }
 0xcf6   :  { %v1124_v16 = vpop.xlane.xlu1 %1123 }
 0xcf7   :  { %v1121_v17 = vpop.xlane.xlu0 %1120 }
 0xd43   :  { %v1200_v11 = vpop.f32.mrb[8].mxu1 }
 0xd44   :  { %v1207_v14 = vrot.slane %v1200_v11, %v2230_v21  ;;  %v1903_v15 = vpop.f32.mrb[9].mxu1 }
 0xd45   :  { %v1590_v15 = vld [vmem:[%s2477_s19 + $0x8] sm:$0xff] }
 0xd46   :  { %v1208_v18 = vadd.f32 %v1207_v14, %v1121_v17  ;;  %v1209_v19 = vadd.f32 %v1207_v14, %v1124_v16  ;;  %v1748_v17 = vld [vmem:[%s2476_s18] ss:$0 sm:$0xff] }
 0xd48   :  { %v1210_v20 = vmul.f32 0.2, %v1208_v18  ;;  %v1211_v22 = vmul.f32 0.2, %v1209_v19 }
 0xd4a   :  { %v1213_v23 = vmax.f32 %v1209_v19, %v1211_v22  ;;  %v1212_v24 = vmax.f32 %v1208_v18, %v1210_v20 }
 0xd4c   :  { %v1215_v25 = vadd.f32 %v1213_v23, %v2241_v33  ;;  %v1214_v26 = vadd.f32 %v1212_v24, %v2236_v30  ;;  %v1750_v23 = vld [vmem:[%s2478_s20] ss:$0 sm:$0xff] }
 0xd4e   :  { %v1219_v27 = vsel %vm272_vm4, %v1215_v25, -inf  ;;  %v1216_v28 = vsel %vm272_vm4, %v1214_v26, -inf }
 0xd4f   :  { %1220 = vmax.xlane.f32.xlu1 %v1219_v27  ;;  %1217 = vmax.xlane.f32.xlu0 %v1216_v28 }
 0xddc   :  { %v1221_v21 = vpop.xlane.xlu1 %1220  ;;  %v1218_v29 = vpop.xlane.xlu0 %1217 }
 0xddd   :  { %v1223_v31 = vsub.f32 %v1215_v25, %v1221_v21  ;;  %v1222_v32 = vsub.f32 %v1214_v26, %v1218_v29 }
 0xddf   :  { %v1226_v34 = vmul.f32 1.442695, %v1223_v31  ;;  %v1224_v35 = vmul.f32 1.442695, %v1222_v32 }
 0xde1   :  { %2049 = vpow2.f32 %v1226_v34 }
 0xde2   :  { %2051 = vpow2.f32 %v1224_v35 }
 0xdeb   :  { %v2050_v36 = vpop.eup %2049 }
 0xdec   :  { %v2052_v37 = vpop.eup %2051  ;;  %v1231_v33 = vsel %vm272_vm4, %v2050_v36, 0.0 }
 0xded   :  { %1232 = vadd.xlane.f32.xlu1 %v1231_v33  ;;  %v1228_v30 = vsel %vm272_vm4, %v2052_v37, 0.0 }
 0xdee   :  { %1229 = vadd.xlane.f32.xlu0 %v1228_v30 }
 0xe7a   :  { %v1233_v38 = vpop.xlane.xlu1 %1232 }
 0xe7b   :  { %2053 = vrcp.f32 %v1233_v38  ;;  %v1230_v39 = vpop.xlane.xlu0 %1229 }
 0xe7c   :  { %2055 = vrcp.f32 %v1230_v39 }
 0xe85   :  { %v2054_v40 = vpop.eup %2053 }
 0xe86   :  { %v2056_v41 = vpop.eup %2055  ;;  %v1237_v42 = vmul.f32 %v2054_v40, %v2050_v36 }
 0xe87   :  { %v1236_v43 = vmul.f32 %v2056_v41, %v2052_v37 }
 0xe89   :  { %1908 = vmatprep.mubr.msk.f32.mxu0 %vm272_vm4, %v1236_v43 }
 0xe8a   :  { %1909 = vmatmul.mubr.msk.f32.vlgmr.msra.gmra.mrb[12].mxu0 %vm272_vm4, %v1237_v42 }
 0xe8b   :  { %1926 = vmatprep.mubr.msk.f32.mxu0 %vm2082_vm1, %v2083_v4  ;;  %2008 = vmatpush3.bf16.msra.mxu0 %v2007_v47 }
 0xe8c   :  { %2009 = vmatprep.subr.bf16.mxu0 %v2081_v3 }
 0xe8f   :  { %2011 = vmatpush3.bf16.msra.mxu0 %v2010_v49 }
 0xe90   :  { %2018 = vmatprep.subr.bf16.mxu0 %v2081_v3 }
 0xf5d   :  { %v1910_v51 = vpop.f32.mrb[12].mxu0 }
 0xf5e   :  { %v1322_v52 = vadd.f32 %v1910_v51, %v1740_v50  ;;  %v1316_v53 = vpop.f32.mrb[13].mxu0 }
 0xf5f   :  { %v1317_v55 = vadd.f32 %v1740_v50, %v1316_v53 }
 0xf60   :  { %v1326_v56 = vmax.f32 %v1322_v52, 0.0 }
 0xf61   :  { %v1325_v58 = vmax.f32 %v1317_v55, 0.0 }
 0xf62   :  { %v1335_v59 = vmul.f32 %v1743_v54, %v1326_v56 }
 0xf63   :  { %v1334_v60 = vmul.f32 %v1743_v54, %v1325_v58 }
 0xf64   :  { %v1344_v61 = vadd.f32 %v1744_v57, %v1335_v59 }
 0xf65   :  { %v1343_v62 = vadd.f32 %v1744_v57, %v1334_v60 }
 0xf67   :  { %v2004_v63 = vpack.c.bf16 %v1344_v61, %v1343_v62 }
 0xf69   :  { %2005 = vmatpush3.bf16.msra.mxu1 %v2004_v63 }
 0xf6a   :  { %2012 = vmatprep.subr.bf16.mxu1 %v2081_v3 }
 0xf6c   :  { %1916 = vmatmul.mubr.msk.f32.vlgmr.msra.gmra.mrb[10].mxu1 %vm272_vm4, %v1345_v0 }
 0xf6d   :  { %1937 = vmatprep.mubr.msk.f32.mxu1 %vm2082_vm1, %v2083_v4  ;;  %2014 = vmatpush3.bf16.msra.mxu1 %v2013_v5 }
 0xf6e   :  { %2015 = vmatprep.subr.bf16.mxu1 %v2081_v3  ;;  %v1746_v3 = vld [vmem:[%s2497_s6] ss:$0 sm:$0xff] }
 0xf71   :  { %2017 = vmatpush3.bf16.msra.mxu1 %v2016_v10 }
0x103f   :  { %v1415_v6 = vpop.f32.mrb[10].mxu1 }
0x1040   :  { %v1917_v7 = vpop.f32.mrb[11].mxu1  ;;  %1927 = vmatmul.mubr.msk.f32.vlgmr.msra.gmra.mrb[14].mxu0 %vm174_vm2, %v1415_v6 }
0x1041   :  { %1944 = vmatprep.mubr.msk.f32.mxu0 %vm2082_vm1, %v2083_v4  ;;  %v1589_v4 = vld [vmem:[%s2477_s19] sm:$0xff]  ;;  %s2057_s19 = scalar_lea.vmem %s1680_s27, 32 }
0x1042   :  { %v2019_v16 = vpack.c.bf16 %v1590_v15, %v1589_v4  ;;  %p2058_p0 = scmp.ne.s32.totalorder %s1680_s27, %s2057_s19  ;;  %p2063_p2 = scmp.lt.s32.totalorder %s2057_s19, %s2057_s19 }
0x1044   :  { %2020 = vmatpush3.bf16.msra.mxu0 %v2019_v16  ;;  %p2064_p3 = por %p2063_p2, %p2062_p1 }
0x1046   :  { %p2065_p4 = pnand %p2064_p3, %p2058_p0 }
0x1113   :  { %v1499_v12 = vpop.f32.mrb[14].mxu0 }
0x1114   :  { %v1500_v13 = vadd.f32 %v1746_v3, %v1499_v12  ;;  %v1928_v11 = vpop.f32.mrb[15].mxu0 }
0x1116   :  { %v1503_v14 = vmax.f32 %v1500_v13, 0.0 }
0x1118   :  { %1938 = vmatmul.mubr.msk.f32.vlgmr.msra.gmra.mrb[12].mxu1 %vm174_vm2, %v1503_v14 }
0x11eb   :  { %v1584_v18 = vpop.f32.mrb[12].mxu1 }
0x11ec   :  { %v1585_v19 = vadd.f32 %v1748_v17, %v1584_v18  ;;  %v1939_v20 = vpop.f32.mrb[13].mxu1 }
0x11ee   :  { %v1588_v22 = vmax.f32 %v1585_v19, 0.0 }
0x11f0   :  { %1945 = vmatmul.mubr.msk.f32.vlgmr.msra.gmra.mrb[16].mxu0 %vm272_vm4, %v1588_v22 }
0x12c3   :  { %v1667_v24 = vpop.f32.mrb[16].mxu0 }
0x12c4   :  { %v1668_v25 = vadd.f32 %v1750_v23, %v1667_v24  ;;  %v1946_v26 = vpop.f32.mrb[17].mxu0 }
0x12c6   :  { %1672 = vst.msk [vmem:[#allocation2] sm:$0x3] %vm1671_vm5, %v1668_v25 }
0x12c7   :  { %2068 = shalt.err (!%p2065_p4)
}
0x12c8   :  { %s2069_s15 = scalar_lea.hbm %s2479_s21, 32 }
0x12c9   :  { %p2070_p5 = scmp.ne.s32.totalorder %s2479_s21, %s2069_s15  ;;  %p2073_p6 = scmp.lt.u32.totalorder %s2069_s15, %s2479_s21 }
0x12cb   :  { %p2075_p7 = pnand %p2073_p6, %p2070_p5 }
0x12cd   :  { %2078 = shalt.err (!%p2075_p7)
}
0x12ce   :  { %1682 = dma.vmem_to_hbm [thread:$0]  %s1680_s27, 32, %s2479_s21, [#allocation3]  }
0x12cf   :  { %2079 = dma.done.wait [#allocation3], 32  }
0x12d0   :  { %2080 = vsyncadd [#allocation3], 4294967264 }
0x12d1   :  { %1686 = vsyncpa [#allocation3], 1 }

</bundles_post_ra>
